<compile_context>
chip_gen: v7x
topology: tpu7x:2x2x1
jax: 0.10.0
libtpu: 0.0.40
codegen_flags: <defaults>
</compile_context>

<pallas_src>
import jax
import jax.numpy as jnp
from jax.experimental import pallas as pl
from jax.experimental.pallas import tpu as pltpu


LANE = 128          # TPU lane width
SUBLANE = 8         # f32 sublane width
TB_MAX = 512        # batch tile cap: 2 x (512*Kp*2B) bf16 x-buffers + weights fits
                    # v7x's 64 MiB VMEM / the 32 MiB scoped default comfortably.
                    # (On v6e/v5e's 128 MiB this could be raised to 2048-4096
                    # together with vmem_limit_bytes.)


def _round_up(n, m):
    return ((n + m - 1) // m) * m


def mlp_kernel(x_ref, w1_ref, b1_ref, w2_ref, b2_ref, w3_ref, b3_ref, o_ref):
    # fc1: bf16 operands on the MXU, f32 accumulation; bias + ReLU in f32 (VPU).
    h1 = jnp.dot(x_ref[...], w1_ref[...], preferred_element_type=jnp.float32)
    h1 = jnp.maximum(h1 + b1_ref[...], 0.0)

    # fc2: cast activations to bf16 for the MXU, keep f32 accumulation.
    h2 = jnp.dot(h1.astype(jnp.bfloat16), w2_ref[...],
                 preferred_element_type=jnp.float32)
    h2 = jnp.maximum(h2 + b2_ref[...], 0.0)

    # fc3 has one output column: a 1-wide MXU matmul would still burn a full
    # 128-wide issue + result-FIFO drain, so use VPU multiply + lane reduction.
    # w3_ref is fc3's weight as a (1, H2p) f32 row; b3 is an SMEM scalar.
    logit = jnp.sum(h2 * w3_ref[...], axis=-1, keepdims=True) + b3_ref[0]
    # Output kept (TB, 1): a lane-dense (1, TB) store would need an in-kernel
    # sublane->lane relayout costing more than the 4 B/row masked store it saves.
    o_ref[...] = jax.nn.sigmoid(logit).astype(o_ref.dtype)


def init_params(key, input_size, hidden_size1, hidden_size2):
    """Torch-layout params with nn.Linear's U(-1/sqrt(fan_in), 1/sqrt(fan_in)) init."""
    ks = jax.random.split(key, 6)

    def linear_init(kw, kb, fan_in, fan_out):
        bound = 1.0 / (fan_in ** 0.5)
        w = jax.random.uniform(kw, (fan_out, fan_in), jnp.float32, -bound, bound)
        b = jax.random.uniform(kb, (fan_out,), jnp.float32, -bound, bound)
        return w, b

    w1, b1 = linear_init(ks[0], ks[1], input_size, hidden_size1)
    w2, b2 = linear_init(ks[2], ks[3], hidden_size1, hidden_size2)
    w3, b3 = linear_init(ks[4], ks[5], hidden_size2, 1)
    return {"w1": w1, "b1": b1, "w2": w2, "b2": b2, "w3": w3, "b3": b3}


def prepare_params(params):
    """Transpose to (in, out), zero-pad feature/hidden dims to multiples of 128
    lanes, and cast the MXU operands to bf16 (biases / fc3 row stay f32 for the
    VPU epilogue).  Padding columns stay zero through ReLU and contribute
    nothing downstream, so the forward is unchanged."""
    w1, b1 = params["w1"], params["b1"]          # (h1, in), (h1,)
    w2, b2 = params["w2"], params["b2"]          # (h2, h1), (h2,)
    w3, b3 = params["w3"], params["b3"]          # (1, h2),  (1,)
    h1, k = w1.shape
    h2 = w2.shape[0]
    kp, h1p, h2p = _round_up(k, LANE), _round_up(h1, LANE), _round_up(h2, LANE)

    def pad2(a, shape):
        return jnp.zeros(shape, a.dtype).at[: a.shape[0], : a.shape[1]].set(a)

    return {
        "w1t": pad2(w1.T, (kp, h1p)).astype(jnp.bfloat16),
        "b1": pad2(b1.reshape(1, -1), (1, h1p)).astype(jnp.float32),
        "w2t": pad2(w2.T, (h1p, h2p)).astype(jnp.bfloat16),
        "b2": pad2(b2.reshape(1, -1), (1, h2p)).astype(jnp.float32),
        "w3r": pad2(w3, (1, h2p)).astype(jnp.float32),
        "b3": b3.reshape(1).astype(jnp.float32),
    }


def simple_classifier_forward(x_nchw, prepared):
    """x_nchw: [B, C, H, W] float32. prepared: output of prepare_params."""
    B = x_nchw.shape[0]
    x_flat = x_nchw.reshape(B, -1)                 # nn.Flatten (row-major)
    K = x_flat.shape[1]

    w1t, b1 = prepared["w1t"], prepared["b1"]
    w2t, b2 = prepared["w2t"], prepared["b2"]
    w3r, b3 = prepared["w3r"], prepared["b3"]
    Kp, H1p = w1t.shape
    H2p = w2t.shape[1]

    # Batch tile: one grid step per TB rows; pad B so the tile divides evenly.
    if B <= TB_MAX:
        TB = _round_up(B, SUBLANE)
        Bp = TB
    else:
        TB = TB_MAX
        Bp = _round_up(B, TB)

    # Pad batch (sublanes) + features (lanes) and cast the MXU operand to bf16
    # (halves the dominant HBM->VMEM traffic).
    x_p = jnp.pad(x_flat, ((0, Bp - B), (0, Kp - K))).astype(jnp.bfloat16)

    grid = (Bp // TB,)
    cost = pl.CostEstimate(
        flops=2 * Bp * (Kp * H1p + H1p * H2p + H2p),
        transcendentals=Bp,                         # sigmoid
        bytes_accessed=(x_p.size * 2 + w1t.size * 2 + w2t.size * 2
                        + (b1.size + b2.size + w3r.size + b3.size) * 4
                        + Bp * 4),
    )

    out_p = pl.pallas_call(
        mlp_kernel,
        out_shape=jax.ShapeDtypeStruct((Bp, 1), jnp.float32),
        grid_spec=pltpu.PrefetchScalarGridSpec(
            num_scalar_prefetch=0,
            grid=grid,
            in_specs=[
                # x: pipelined over the batch grid (DMA of i+1 overlaps compute of i).
                pl.BlockSpec((TB, Kp), lambda i: (i, 0)),
                # Weights/biases: constant index_map -> DMA'd once, VMEM-resident.
                pl.BlockSpec((Kp, H1p), lambda i: (0, 0)),
                pl.BlockSpec((1, H1p), lambda i: (0, 0)),
                pl.BlockSpec((H1p, H2p), lambda i: (0, 0)),
                pl.BlockSpec((1, H2p), lambda i: (0, 0)),
                pl.BlockSpec((1, H2p), lambda i: (0, 0)),
                # fc3 bias: single scalar -> SMEM (avoids an (8,128)-padded VMEM tile).
                pl.BlockSpec(memory_space=pltpu.MemorySpace.SMEM),
            ],
            out_specs=pl.BlockSpec((TB, 1), lambda i: (i, 0)),
        ),
        compiler_params=pltpu.CompilerParams(
            # Batch blocks are independent -> shard across v7x's 2 TensorCores
            # (no effect on single-TC v5e/v6e).
            dimension_semantics=("parallel",),
        ),
        cost_estimate=cost,
    )(x_p, w1t, b1, w2t, b2, w3r, b3)

    return out_p[:B]


def reference_forward(x_nchw, params):
    """Pure-JAX f32 reference of the PyTorch forward for verification."""
    x = x_nchw.reshape(x_nchw.shape[0], -1)
    h1 = jnp.maximum(x @ params["w1"].T + params["b1"], 0.0)
    h2 = jnp.maximum(h1 @ params["w2"].T + params["b2"], 0.0)
    return jax.nn.sigmoid(h2 @ params["w3"].T + params["b3"])


if __name__ == "__main__":
    # Small shapes: x is [B=2, C=4, H=16, W=16] -> input_size = 4*16*16 = 1024.
    B, C, H, W = 2, 4, 16, 16
    input_size = C * H * W
    hidden_size1, hidden_size2 = 32, 16

    key = jax.random.PRNGKey(0)
    kx, kp = jax.random.split(key)
    x = jax.random.normal(kx, (B, C, H, W), jnp.float32)
    params = init_params(kp, input_size, hidden_size1, hidden_size2)
    prepared = prepare_params(params)

    forward = jax.jit(simple_classifier_forward)
    out = jax.block_until_ready(forward(x, prepared))

    ref = reference_forward(x, params)
    assert out.shape == (B, 1), out.shape
    # bf16 matmul operands (f32 accumulation) -> loosened tolerance vs f32 reference.
    assert jnp.allclose(out, ref, atol=2e-2, rtol=0.0), (out, ref)

    print("KERNEL_OK")
</pallas_src>

<mosaic_0001>
module attributes {stable_mosaic.version = 11 : i64} {
  func.func @mlp_kernel(%arg0: i32, %arg1: memref<8x1024xbf16, #tpu.memory_space<vmem>>, %arg2: memref<1024x128xbf16, #tpu.memory_space<vmem>>, %arg3: memref<1x128xf32, #tpu.memory_space<vmem>>, %arg4: memref<128x128xbf16, #tpu.memory_space<vmem>>, %arg5: memref<1x128xf32, #tpu.memory_space<vmem>>, %arg6: memref<1x128xf32, #tpu.memory_space<vmem>>, %arg7: memref<1xf32, #tpu.memory_space<smem>>, %arg8: memref<8x1xf32, #tpu.memory_space<vmem>>) attributes {dimension_semantics = [#tpu.dimension_semantics<parallel>], iteration_bounds = array<i64: 1>, scalar_prefetch = 0 : i64, scratch_operands = 0 : i64, tpu.core_type = #tpu.core_type<tc>, window_params = [{transform_indices = @transform_0, window_bounds = array<i64: 8, 1024>}, {pipeline_mode = #tpu.pipeline_mode<synchronous>, transform_indices = @transform_1, window_bounds = array<i64: 1024, 128>}, {pipeline_mode = #tpu.pipeline_mode<synchronous>, transform_indices = @transform_2, window_bounds = array<i64: 1, 128>}, {pipeline_mode = #tpu.pipeline_mode<synchronous>, transform_indices = @transform_3, window_bounds = array<i64: 128, 128>}, {pipeline_mode = #tpu.pipeline_mode<synchronous>, transform_indices = @transform_4, window_bounds = array<i64: 1, 128>}, {pipeline_mode = #tpu.pipeline_mode<synchronous>, transform_indices = @transform_5, window_bounds = array<i64: 1, 128>}, {transform_indices = @transform_6, window_bounds = array<i64: 1>}, {transform_indices = @transform_7, window_bounds = array<i64: 8, 1>}]} {
    %c0 = arith.constant 0 : index
    %c0_0 = arith.constant 0 : index
    %0 = vector.load %arg1[%c0, %c0_0] : memref<8x1024xbf16, #tpu.memory_space<vmem>>, vector<8x1024xbf16>
    %c0_1 = arith.constant 0 : index
    %c0_2 = arith.constant 0 : index
    %1 = vector.load %arg2[%c0_1, %c0_2] : memref<1024x128xbf16, #tpu.memory_space<vmem>>, vector<1024x128xbf16>
    %cst = arith.constant dense<0.000000e+00> : vector<8x128xf32>
    %2 = tpu.matmul %0, %1, %cst {dimension_numbers = #tpu.dot_dimension_numbers<[1], [0], [0], [1], [0, 0, 1, 1], [], []>} : vector<8x1024xbf16>, vector<1024x128xbf16>, vector<8x128xf32> -> vector<8x128xf32>
    %c0_3 = arith.constant 0 : index
    %c0_4 = arith.constant 0 : index
    %3 = vector.load %arg3[%c0_3, %c0_4] : memref<1x128xf32, #tpu.memory_space<vmem>>, vector<1x128xf32>
    %4 = vector.broadcast %3 : vector<1x128xf32> to vector<8x128xf32>
    %5 = arith.addf %2, %4 : vector<8x128xf32>
    %cst_5 = arith.constant 0.000000e+00 : f32
    %6 = vector.broadcast %cst_5 : f32 to vector<8x128xf32>
    %7 = arith.maximumf %5, %6 : vector<8x128xf32>
    %8 = arith.truncf %7 : vector<8x128xf32> to vector<8x128xbf16>
    %c0_6 = arith.constant 0 : index
    %c0_7 = arith.constant 0 : index
    %9 = vector.load %arg4[%c0_6, %c0_7] : memref<128x128xbf16, #tpu.memory_space<vmem>>, vector<128x128xbf16>
    %cst_8 = arith.constant dense<0.000000e+00> : vector<8x128xf32>
    %10 = tpu.matmul %8, %9, %cst_8 {dimension_numbers = #tpu.dot_dimension_numbers<[1], [0], [0], [1], [0, 0, 1, 1], [], []>} : vector<8x128xbf16>, vector<128x128xbf16>, vector<8x128xf32> -> vector<8x128xf32>
    %c0_9 = arith.constant 0 : index
    %c0_10 = arith.constant 0 : index
    %11 = vector.load %arg5[%c0_9, %c0_10] : memref<1x128xf32, #tpu.memory_space<vmem>>, vector<1x128xf32>
    %12 = vector.broadcast %11 : vector<1x128xf32> to vector<8x128xf32>
    %13 = arith.addf %10, %12 : vector<8x128xf32>
    %cst_11 = arith.constant 0.000000e+00 : f32
    %14 = vector.broadcast %cst_11 : f32 to vector<8x128xf32>
    %15 = arith.maximumf %13, %14 : vector<8x128xf32>
    %c0_12 = arith.constant 0 : index
    %c0_13 = arith.constant 0 : index
    %16 = vector.load %arg6[%c0_12, %c0_13] : memref<1x128xf32, #tpu.memory_space<vmem>>, vector<1x128xf32>
    %17 = vector.broadcast %16 : vector<1x128xf32> to vector<8x128xf32>
    %18 = arith.mulf %15, %17 : vector<8x128xf32>
    %cst_14 = arith.constant dense<0.000000e+00> : vector<8xf32>
    %19 = vector.multi_reduction <add>, %18, %cst_14 [1] : vector<8x128xf32> to vector<8xf32>
    %20 = vector.shape_cast %19 : vector<8xf32> to vector<8x1xf32>
    %c0_15 = arith.constant 0 : index
    %21 = memref.load %arg7[%c0_15] : memref<1xf32, #tpu.memory_space<smem>>
    %22 = vector.broadcast %21 : f32 to vector<8x1xf32>
    %23 = arith.addf %20, %22 : vector<8x1xf32>
    %24 = arith.negf %23 : vector<8x1xf32>
    %25 = math.exp %24 : vector<8x1xf32>
    %cst_16 = arith.constant 1.000000e+00 : f32
    %26 = vector.broadcast %cst_16 : f32 to vector<8x1xf32>
    %27 = arith.addf %26, %25 : vector<8x1xf32>
    %28 = arith.divf %26, %27 : vector<8x1xf32>
    %c0_17 = arith.constant 0 : index
    %c0_18 = arith.constant 0 : index
    %29 = vector.load %arg8[%c0_17, %c0_18] : memref<8x1xf32, #tpu.memory_space<vmem>>, vector<8x1xf32>
    tpu.vector_store %arg8[%c0_17, %c0_18], %28 {strides = array<i32>} : memref<8x1xf32, #tpu.memory_space<vmem>>, vector<8x1xf32>,
    return
  }
  func.func @transform_0(%arg0: i32) -> (i32, i32) {
    %c0_i32 = arith.constant 0 : i32
    %c0_i32_0 = arith.constant 0 : i32
    return %arg0, %c0_i32 : i32, i32
  }
  func.func @transform_1(%arg0: i32) -> (i32, i32) {
    %c0_i32 = arith.constant 0 : i32
    %c0_i32_0 = arith.constant 0 : i32
    %c0_i32_1 = arith.constant 0 : i32
    return %c0_i32, %c0_i32_0 : i32, i32
  }
  func.func @transform_2(%arg0: i32) -> (i32, i32) {
    %c0_i32 = arith.constant 0 : i32
    %c0_i32_0 = arith.constant 0 : i32
    %c0_i32_1 = arith.constant 0 : i32
    return %c0_i32, %c0_i32_0 : i32, i32
  }
  func.func @transform_3(%arg0: i32) -> (i32, i32) {
    %c0_i32 = arith.constant 0 : i32
    %c0_i32_0 = arith.constant 0 : i32
    %c0_i32_1 = arith.constant 0 : i32
    return %c0_i32, %c0_i32_0 : i32, i32
  }
  func.func @transform_4(%arg0: i32) -> (i32, i32) {
    %c0_i32 = arith.constant 0 : i32
    %c0_i32_0 = arith.constant 0 : i32
    %c0_i32_1 = arith.constant 0 : i32
    return %c0_i32, %c0_i32_0 : i32, i32
  }
  func.func @transform_5(%arg0: i32) -> (i32, i32) {
    %c0_i32 = arith.constant 0 : i32
    %c0_i32_0 = arith.constant 0 : i32
    %c0_i32_1 = arith.constant 0 : i32
    return %c0_i32, %c0_i32_0 : i32, i32
  }
  func.func @transform_6(%arg0: i32) -> i32 {
    %c0_i32 = arith.constant 0 : i32
    %c0_i32_0 = arith.constant 0 : i32
    return %c0_i32 : i32
  }
  func.func @transform_7(%arg0: i32) -> (i32, i32) {
    %c0_i32 = arith.constant 0 : i32
    %c0_i32_0 = arith.constant 0 : i32
    return %arg0, %c0_i32 : i32, i32
  }
}

</mosaic_0001>

<bundles_post_ra>
// kernel: simple_classifier_forward.1
= control target key start
LH: loop header
LB: loop body
LE: loop exit
PB: predicated region body
PF: predicated region fallthrough
CT: control target
= control target key end

     0   :  { %13 = vsyncpa [#allocation4], 0  ;;  %s1207_s24 = smov [#allocation3]   ;;  %s1315_s0 = inlined_call_operand.vmem [shape: bf16[8,1024], index: 0, kind: input, shape index: {}]   ;;  %s1316_s1 = inlined_call_operand.hbm [shape: bf16[1024,128], index: 1, kind: input, shape index: {}]   ;;  %s1317_s2 = inlined_call_operand.vmem [shape: f32[1,128], index: 2, kind: input, shape index: {}]   ;;  %s1318_s3 = inlined_call_operand.vmem [shape: bf16[128,128], index: 3, kind: input, shape index: {}]   ;;  %s1319_s4 = inlined_call_operand.vmem [shape: f32[1,128], index: 4, kind: input, shape index: {}]   ;;  %s1320_s5 = inlined_call_operand.vmem [shape: f32[1,128], index: 5, kind: input, shape index: {}]   ;;  %s1321_s6 = inlined_call_operand.<no memory space> [shape: f32[1], index: 6, kind: input, shape index: {}]   ;;  %s1322_s7 = inlined_call_operand.vmem [shape: f32[8,1], index: 7, kind: output, shape index: {}]  }
   0x1   :  { %s21_s25 = sshll.u32 %s1207_s24, 4  ;;  %s1183_s28 = scalar_lea.hbm %s1316_s1, 8192  ;;  %s22_s25 = int_to_ptr.vmem [resolvable:$true] %s21_s25 }
   0x2   :  { %p1184_p0 = scmp.ne.s32.totalorder %s1316_s1, %s1183_s28  ;;  %p1187_p1 = scmp.lt.u32.totalorder %s1183_s28, %s1316_s1 }
   0x4   :  { %p1189_p2 = pnand %p1187_p1, %p1184_p0 }
   0x6   :  { %1192 = shalt.err (!%p1189_p2)
}
   0x7   :  { %s1193_s10 = scalar_lea.vmem %s22_s25, 8192  ;;  %p1198_p4 = scmp.lt.s32.totalorder %s22_s25, %s22_s25 }
   0x8   :  { %p1194_p3 = scmp.ne.s32.totalorder %s22_s25, %s1193_s10  ;;  %p1199_p5 = scmp.lt.s32.totalorder %s1193_s10, %s1193_s10 }
   0xa   :  { %p1200_p6 = por %p1199_p5, %p1198_p4 }
   0xc   :  { %p1201_p7 = pnand %p1200_p6, %p1194_p3 }
   0xe   :  { %1204 = shalt.err (!%p1201_p7)
}
   0xf   :  { %s1208_s11 = smov 64   ;;  %s1209_s12 = smov 4  }
  0x10   :  { %27 = dma.hbm_to_vmem [thread:$0]  %s1316_s1, 8192, %s22_s25, [#allocation4], %s1208_s11, %s1208_s11, %s1209_s12  }
  0x11   :  { %1205 = dma.done.wait [#allocation4], 8192  }
  0x12   :  { %1206 = vsyncadd [#allocation4], 4294959104  ;;  %v1099_v0 = vld [vmem:[#allocation3 + $0x40] sm:$0xff]   ;;  %v1103_v4 = vld [vmem:[#allocation3 + $0x48] sm:$0xff]   ;;  %vm1211_vm0 = vmmov 0   ;;  %vm886_vm1 = vcmask 7168  }
  0x13   :  { %v1100_v1 = vld [vmem:[#allocation3 + $0xc0] sm:$0xff]   ;;  %977 = vmatprep.subr.bf16.mxu0 %v1099_v0  ;;  %v1104_v5 = vld [vmem:[#allocation3 + $0xc8] sm:$0xff]   ;;  %v1107_v8 = vld [vmem:[#allocation3 + $0x50] sm:$0xff]  }
  0x14   :  { %v1101_v2 = vld [vmem:[#allocation3] sm:$0xff]   ;;  %999 = vmatprep.subr.bf16.mxu1 %v1100_v1  ;;  %v1105_v6 = vld [vmem:[#allocation3 + $0x8] sm:$0xff]   ;;  %v1108_v9 = vld [vmem:[#allocation3 + $0xd0] sm:$0xff]  }
  0x15   :  { %v1102_v3 = vld [vmem:[#allocation3 + $0x80] sm:$0xff]   ;;  %978 = vmatpush3.bf16.msra.mxu0 %v1101_v2  ;;  %v1106_v7 = vld [vmem:[#allocation3 + $0x88] sm:$0xff]   ;;  %v1109_v10 = vld [vmem:[#allocation3 + $0x10] sm:$0xff]  }
  0x16   :  { %1000 = vmatpush3.bf16.msra.mxu1 %v1102_v3  ;;  %979 = vmatprep.subr.bf16.mxu0 %v1103_v4  ;;  %v1110_v11 = vld [vmem:[#allocation3 + $0x90] sm:$0xff]   ;;  %v1111_v12 = vld [vmem:[#allocation3 + $0x58] sm:$0xff]   ;;  %v1115_v16 = vld [vmem:[#allocation3 + $0x60] sm:$0xff]  }
  0x17   :  { %1001 = vmatprep.subr.bf16.mxu1 %v1104_v5  ;;  %v1112_v13 = vld [vmem:[#allocation3 + $0xd8] sm:$0xff]   ;;  %v1116_v17 = vld [vmem:[#allocation3 + $0xe0] sm:$0xff]   ;;  %v1119_v20 = vld [vmem:[#allocation3 + $0x68] sm:$0xff]  }
  0x18   :  { %v1113_v14 = vld [vmem:[#allocation3 + $0x18] sm:$0xff]   ;;  %v1117_v18 = vld [vmem:[#allocation3 + $0x20] sm:$0xff]   ;;  %v1120_v21 = vld [vmem:[#allocation3 + $0xe8] sm:$0xff]  }
  0x19   :  { %980 = vmatpush3.bf16.msra.mxu0 %v1105_v6  ;;  %v1114_v15 = vld [vmem:[#allocation3 + $0x98] sm:$0xff]   ;;  %v1118_v19 = vld [vmem:[#allocation3 + $0xa0] sm:$0xff]   ;;  %v1121_v22 = vld [vmem:[#allocation3 + $0x28] sm:$0xff]  }
  0x1a   :  { %1002 = vmatpush3.bf16.msra.mxu1 %v1106_v7  ;;  %981 = vmatprep.subr.bf16.mxu0 %v1107_v8  ;;  %v1122_v23 = vld [vmem:[#allocation3 + $0xa8] sm:$0xff]   ;;  %v1123_v24 = vld [vmem:[#allocation3 + $0x70] sm:$0xff]   ;;  %v1127_v28 = vld [vmem:[#allocation3 + $0x78] sm:$0xff]  }
  0x1b   :  { %1003 = vmatprep.subr.bf16.mxu1 %v1108_v9  ;;  %v1124_v25 = vld [vmem:[#allocation3 + $0xf0] sm:$0xff]   ;;  %v1128_v29 = vld [vmem:[#allocation3 + $0xf8] sm:$0xff]   ;;  %v42_v32 = vld [vmem:[%s1315_s0] sm:$0xff] }
  0x1c   :  { %v1125_v26 = vld [vmem:[#allocation3 + $0x30] sm:$0xff]   ;;  %v1129_v30 = vld [vmem:[#allocation3 + $0x38] sm:$0xff]   ;;  %v43_v33 = vld [vmem:[%s1315_s0 + $0x8] sm:$0xff]  ;;  %v894_v34 = vcombine.low %v42_v32, %v42_v32  ;;  %v895_v35 = vcombine.high %v42_v32, %v42_v32 }
  0x1d   :  { %982 = vmatpush3.bf16.msra.mxu0 %v1109_v10  ;;  %v1126_v27 = vld [vmem:[#allocation3 + $0xb0] sm:$0xff]   ;;  %v1130_v31 = vld [vmem:[#allocation3 + $0xb8] sm:$0xff]   ;;  %v896_v36 = vcombine.low %v43_v33, %v43_v33  ;;  %v897_v37 = vcombine.high %v43_v33, %v43_v33  ;;  %v1135_v38 = vld [vmem:[#allocation3 + $0x140] sm:$0xff]  }
  0x1e   :  { %1004 = vmatpush3.bf16.msra.mxu1 %v1110_v11  ;;  %983 = vmatprep.subr.bf16.mxu0 %v1111_v12  ;;  %v1136_v39 = vld [vmem:[#allocation3 + $0x1c0] sm:$0xff]   ;;  %v1139_v42 = vld [vmem:[#allocation3 + $0x148] sm:$0xff]   ;;  %v1143_v46 = vld [vmem:[#allocation3 + $0x150] sm:$0xff]  }
  0x1f   :  { %1005 = vmatprep.subr.bf16.mxu1 %v1112_v13  ;;  %625 = vmatprep.mubr.bf16.mxu0 %v895_v35  ;;  %v1137_v40 = vld [vmem:[#allocation3 + $0x100] sm:$0xff]   ;;  %v1140_v43 = vld [vmem:[#allocation3 + $0x1c8] sm:$0xff]   ;;  %v1144_v47 = vld [vmem:[#allocation3 + $0x1d0] sm:$0xff]   ;;  %v1210_v13 = vmov 0.0  }
  0x20   :  { %665 = vmatprep.mubr.bf16.mxu1 %v897_v37  ;;  %v1138_v41 = vld [vmem:[#allocation3 + $0x180] sm:$0xff]   ;;  %v1141_v44 = vld [vmem:[#allocation3 + $0x108] sm:$0xff]   ;;  %v1145_v48 = vld [vmem:[#allocation3 + $0x110] sm:$0xff]  }
  0x21   :  { %984 = vmatpush3.bf16.msra.mxu0 %v1113_v14  ;;  %v1142_v45 = vld [vmem:[#allocation3 + $0x188] sm:$0xff]   ;;  %v1146_v49 = vld [vmem:[#allocation3 + $0x190] sm:$0xff]   ;;  %v1147_v50 = vld [vmem:[#allocation3 + $0x158] sm:$0xff]  }
  0x22   :  { %1006 = vmatpush3.bf16.msra.mxu1 %v1114_v15  ;;  %985 = vmatprep.subr.bf16.mxu0 %v1115_v16  ;;  %v1148_v51 = vld [vmem:[#allocation3 + $0x1d8] sm:$0xff]   ;;  %v1151_v54 = vld [vmem:[#allocation3 + $0x160] sm:$0xff]   ;;  %v1155_v58 = vld [vmem:[#allocation3 + $0x168] sm:$0xff]  }
  0x23   :  { %1007 = vmatprep.subr.bf16.mxu1 %v1116_v17  ;;  %v1149_v52 = vld [vmem:[#allocation3 + $0x118] sm:$0xff]   ;;  %v1152_v55 = vld [vmem:[#allocation3 + $0x1e0] sm:$0xff]   ;;  %v1156_v59 = vld [vmem:[#allocation3 + $0x1e8] sm:$0xff]  }
  0x24   :  { %v1150_v53 = vld [vmem:[#allocation3 + $0x198] sm:$0xff]   ;;  %v1153_v56 = vld [vmem:[#allocation3 + $0x120] sm:$0xff]   ;;  %v1157_v60 = vld [vmem:[#allocation3 + $0x128] sm:$0xff]  }
  0x25   :  { %986 = vmatpush3.bf16.msra.mxu0 %v1117_v18  ;;  %v1154_v57 = vld [vmem:[#allocation3 + $0x1a0] sm:$0xff]   ;;  %v1158_v61 = vld [vmem:[#allocation3 + $0x1a8] sm:$0xff]   ;;  %v1159_v62 = vld [vmem:[#allocation3 + $0x170] sm:$0xff]  }
  0x26   :  { %1008 = vmatpush3.bf16.msra.mxu1 %v1118_v19  ;;  %987 = vmatprep.subr.bf16.mxu0 %v1119_v20  ;;  %v1160_v63 = vld [vmem:[#allocation3 + $0x1f0] sm:$0xff]   ;;  %v1163_v2 = vld [vmem:[#allocation3 + $0x178] sm:$0xff]   ;;  %v1171_v12 = vld [vmem:[%s1318_s3] sm:$0xff]  }
  0x27   :  { %1009 = vmatprep.subr.bf16.mxu1 %v1120_v21  ;;  %v1161_v0 = vld [vmem:[#allocation3 + $0x130] sm:$0xff]   ;;  %v1164_v3 = vld [vmem:[#allocation3 + $0x1f8] sm:$0xff]   ;;  %v1172_v14 = vld [vmem:[%s1318_s3 + $0x8] sm:$0xff]  }
  0x28   :  { %v1162_v1 = vld [vmem:[#allocation3 + $0x1b0] sm:$0xff]   ;;  %v1165_v4 = vld [vmem:[#allocation3 + $0x138] sm:$0xff]   ;;  %v1175_v17 = vld [vmem:[%s1318_s3 + $0x20] sm:$0xff]  }
  0x29   :  { %988 = vmatpush3.bf16.msra.mxu0 %v1121_v22  ;;  %v1166_v5 = vld [vmem:[#allocation3 + $0x1b8] sm:$0xff]   ;;  %v44_v6 = vld [vmem:[%s1315_s0 + $0x10] sm:$0xff]  ;;  %v1176_v18 = vld [vmem:[%s1318_s3 + $0x28] sm:$0xff]  }
  0x2a   :  { %1010 = vmatpush3.bf16.msra.mxu1 %v1122_v23  ;;  %989 = vmatprep.subr.bf16.mxu0 %v1123_v24  ;;  %v898_v7 = vcombine.low %v44_v6, %v44_v6  ;;  %v899_v8 = vcombine.high %v44_v6, %v44_v6  ;;  %v45_v9 = vld [vmem:[%s1315_s0 + $0x18] sm:$0xff]  ;;  %v1173_v15 = vld [vmem:[%s1318_s3 + $0x10] sm:$0xff]   ;;  %v893_v23 = vld [vmem:[%s1317_s2] ss:$0 sm:$0xff] }
  0x2b   :  { %1011 = vmatprep.subr.bf16.mxu1 %v1124_v25  ;;  %v900_v10 = vcombine.low %v45_v9, %v45_v9  ;;  %v901_v11 = vcombine.high %v45_v9, %v45_v9  ;;  %v1174_v16 = vld [vmem:[%s1318_s3 + $0x18] sm:$0xff]   ;;  %v1177_v19 = vld [vmem:[%s1318_s3 + $0x30] sm:$0xff]  }
  0x2c   :  { %v1178_v20 = vld [vmem:[%s1318_s3 + $0x38] sm:$0xff]  }
  0x2d   :  { %990 = vmatpush3.bf16.msra.mxu0 %v1125_v26 }
  0x2e   :  { %1012 = vmatpush3.bf16.msra.mxu1 %v1126_v27  ;;  %991 = vmatprep.subr.bf16.mxu0 %v1127_v28 }
  0x2f   :  { %1013 = vmatprep.subr.bf16.mxu1 %v1128_v29 }
  0x31   :  { %992 = vmatpush3.bf16.msra.mxu0 %v1129_v30 }
  0x32   :  { %1014 = vmatpush3.bf16.msra.mxu1 %v1130_v31  ;;  %1021 = vmatprep.subr.bf16.mxu0 %v1135_v38 }
  0x33   :  { %1043 = vmatprep.subr.bf16.mxu1 %v1136_v39 }
  0x34   :  { %626 = vmatmul.mubr.bf16.vlgmr.msra.gmra.mrb[0].mxu0 %v894_v34 }
  0x35   :  { %666 = vmatmul.mubr.bf16.vlgmr.msra.gmra.mrb[0].mxu1 %v896_v36  ;;  %1022 = vmatpush3.bf16.msra.mxu0 %v1137_v40 }
  0x36   :  { %1044 = vmatpush3.bf16.msra.mxu1 %v1138_v41  ;;  %1023 = vmatprep.subr.bf16.mxu0 %v1139_v42 }
  0x37   :  { %1045 = vmatprep.subr.bf16.mxu1 %v1140_v43  ;;  %705 = vmatprep.mubr.bf16.mxu0 %v899_v8 }
  0x38   :  { %745 = vmatprep.mubr.bf16.mxu1 %v901_v11 }
  0x39   :  { %1024 = vmatpush3.bf16.msra.mxu0 %v1141_v44 }
  0x3a   :  { %1046 = vmatpush3.bf16.msra.mxu1 %v1142_v45  ;;  %1025 = vmatprep.subr.bf16.mxu0 %v1143_v46 }
  0x3b   :  { %1047 = vmatprep.subr.bf16.mxu1 %v1144_v47 }
  0x3d   :  { %1026 = vmatpush3.bf16.msra.mxu0 %v1145_v48  ;;  %v966_v48 = vld [vmem:[%s1319_s4] ss:$0 sm:$0xff] }
  0x3e   :  { %1048 = vmatpush3.bf16.msra.mxu1 %v1146_v49  ;;  %1027 = vmatprep.subr.bf16.mxu0 %v1147_v50 }
  0x3f   :  { %1049 = vmatprep.subr.bf16.mxu1 %v1148_v51 }
  0x41   :  { %1028 = vmatpush3.bf16.msra.mxu0 %v1149_v52 }
  0x42   :  { %1050 = vmatpush3.bf16.msra.mxu1 %v1150_v53  ;;  %1029 = vmatprep.subr.bf16.mxu0 %v1151_v54  ;;  %v975_v53 = vld [vmem:[%s1320_s5] ss:$0 sm:$0xff] }
  0x43   :  { %1051 = vmatprep.subr.bf16.mxu1 %v1152_v55 }
  0x45   :  { %1030 = vmatpush3.bf16.msra.mxu0 %v1153_v56 }
  0x46   :  { %1052 = vmatpush3.bf16.msra.mxu1 %v1154_v57  ;;  %1031 = vmatprep.subr.bf16.mxu0 %v1155_v58  ;;  %v878_v57 = vstv %s1321_s6 }
  0x47   :  { %1053 = vmatprep.subr.bf16.mxu1 %v1156_v59 }
  0x49   :  { %1032 = vmatpush3.bf16.msra.mxu0 %v1157_v60 }
  0x4a   :  { %1054 = vmatpush3.bf16.msra.mxu1 %v1158_v61  ;;  %1033 = vmatprep.subr.bf16.mxu0 %v1159_v62 }
  0x4b   :  { %1055 = vmatprep.subr.bf16.mxu1 %v1160_v63 }
  0x4d   :  { %1034 = vmatpush3.bf16.msra.mxu0 %v1161_v0 }
  0x4e   :  { %1056 = vmatpush3.bf16.msra.mxu1 %v1162_v1  ;;  %1035 = vmatprep.subr.bf16.mxu0 %v1163_v2 }
  0x4f   :  { %1057 = vmatprep.subr.bf16.mxu1 %v1164_v3 }
  0x51   :  { %1036 = vmatpush3.bf16.msra.mxu0 %v1165_v4 }
  0x52   :  { %1058 = vmatpush3.bf16.msra.mxu1 %v1166_v5  ;;  %1074 = vmatprep.subr.bf16.mxu0 %v1210_v13 }
  0x54   :  { %706 = vmatmul.mubr.bf16.vlgmr.msra.gmra.mrb[4].mxu0 %v898_v7 }
  0x55   :  { %746 = vmatmul.mubr.bf16.vlgmr.msra.gmra.mrb[4].mxu1 %v900_v10  ;;  %1075 = vmatpush3.bf16.msra.mxu0 %v1171_v12 }
  0x56   :  { %1076 = vmatprep.subr.bf16.mxu0 %v1210_v13  ;;  %1090 = vmatprep.mubr.msk.bf16.mxu0 %vm1211_vm0, %v1210_v13 }
  0x59   :  { %1077 = vmatpush3.bf16.msra.mxu0 %v1172_v14 }
  0x5a   :  { %1078 = vmatprep.subr.bf16.mxu0 %v1210_v13 }
  0x5d   :  { %1079 = vmatpush3.bf16.msra.mxu0 %v1173_v15 }
  0x5e   :  { %1080 = vmatprep.subr.bf16.mxu0 %v1210_v13 }
  0x61   :  { %1081 = vmatpush3.bf16.msra.mxu0 %v1174_v16 }
  0x62   :  { %1082 = vmatprep.subr.bf16.mxu0 %v1210_v13 }
  0x65   :  { %1083 = vmatpush3.bf16.msra.mxu0 %v1175_v17 }
  0x66   :  { %1084 = vmatprep.subr.bf16.mxu0 %v1210_v13 }
  0x69   :  { %1085 = vmatpush3.bf16.msra.mxu0 %v1176_v18 }
  0x6a   :  { %1086 = vmatprep.subr.bf16.mxu0 %v1210_v13 }
  0x6d   :  { %1087 = vmatpush3.bf16.msra.mxu0 %v1177_v19 }
  0x6e   :  { %1088 = vmatprep.subr.bf16.mxu0 %v1210_v13 }
  0x71   :  { %1089 = vmatpush3.bf16.msra.mxu0 %v1178_v20 }
 0x107   :  { %v993_v21 = vpop.f32.mrb[0].mxu0 }
 0x108   :  { %v1015_v22 = vpop.f32.mrb[0].mxu1  ;;  %v994_v24 = vpop.f32.mrb[1].mxu0 }
 0x109   :  { %v1016_v25 = vpop.f32.mrb[1].mxu1  ;;  %v995_v26 = vadd.f32 %v994_v24, %v993_v21  ;;  %v996_v28 = vpop.f32.mrb[2].mxu0 }
 0x10a   :  { %v1017_v27 = vadd.f32 %v1016_v25, %v1015_v22  ;;  %v1018_v29 = vpop.f32.mrb[2].mxu1  ;;  %v997_v30 = vpop.f32.mrb[3].mxu0 }
 0x10b   :  { %v1019_v31 = vpop.f32.mrb[3].mxu1  ;;  %v628_v32 = vadd.f32 %v995_v26, %v893_v23 }
 0x10d   :  { %v668_v33 = vadd.f32 %v1017_v27, %v628_v32 }
 0x127   :  { %v1037_v34 = vpop.f32.mrb[4].mxu0 }
 0x128   :  { %v1059_v35 = vpop.f32.mrb[4].mxu1  ;;  %v1038_v36 = vpop.f32.mrb[5].mxu0 }
 0x129   :  { %v1060_v37 = vpop.f32.mrb[5].mxu1  ;;  %v1039_v38 = vadd.f32 %v1038_v36, %v1037_v34  ;;  %v1040_v40 = vpop.f32.mrb[6].mxu0 }
 0x12a   :  { %v1061_v39 = vadd.f32 %v1060_v37, %v1059_v35  ;;  %v1062_v41 = vpop.f32.mrb[6].mxu1  ;;  %v1041_v42 = vpop.f32.mrb[7].mxu0 }
 0x12b   :  { %v1063_v43 = vpop.f32.mrb[7].mxu1  ;;  %v708_v44 = vadd.f32 %v1039_v38, %v668_v33 }
 0x12d   :  { %v748_v45 = vadd.f32 %v1061_v39, %v708_v44 }
 0x12f   :  { %v753_v46 = vmax.f32 %v748_v45, 0.0 }
 0x131   :  { %v754_v47 = vpack.c.bf16 %v753_v46, %v753_v46 }
 0x133   :  { %1091 = vmatmul.mubr.bf16.vlgmr.msra.gmra.mrb[8].mxu0 %v754_v47 }
 0x206   :  { %v860_v49 = vpop.f32.mrb[8].mxu0 }
 0x207   :  { %v861_v50 = vadd.f32 %v966_v48, %v860_v49  ;;  %v1092_v51 = vpop.f32.mrb[9].mxu0 }
 0x208   :  { %v863_v52 = vpop.f32.mrb[10].mxu0 }
 0x209   :  { %v866_v54 = vmax.f32 %v861_v50, 0.0  ;;  %v1093_v55 = vpop.f32.mrb[11].mxu0 }
 0x20b   :  { %v874_v56 = vmul.f32 %v975_v53, %v866_v54 }
 0x20d   :  { %875 = vadd.xlane.f32.xlu0 %v874_v56 }
 0x29a   :  { %v876_v58 = vpop.xlane.xlu0 %875 }
 0x29b   :  { %v879_v59 = vadd.f32 %v878_v57, %v876_v58 }
 0x29d   :  { %v976_v60 = vmul.f32 -1.442695, %v879_v59 }
 0x29f   :  { %1179 = vpow2.f32 %v976_v60 }
 0x2a9   :  { %v1180_v61 = vpop.eup %1179 }
 0x2aa   :  { %v883_v62 = vadd.f32 1.0, %v1180_v61 }
 0x2ac   :  { %1181 = vrcp.f32 %v883_v62 }
 0x2b6   :  { %v1182_v63 = vpop.eup %1181 }
 0x2b7   :  { %887 = vst.msk [vmem:[%s1322_s7] sm:$0xff] %vm886_vm1, %v1182_v63 }
 0x2b8   :  { %892 = vsyncpa [#allocation4], 1 }

</bundles_post_ra>
